<compile_context>
chip_gen: v6e
topology: v6e:2x2x1
jax: 0.10.0
libtpu: 0.0.40
codegen_flags: <defaults>
</compile_context>

<pallas_src>
import jax
import jax.numpy as jnp
from jax.experimental import pallas as pl
from jax.experimental.pallas import tpu as pltpu


# Explicit scoped-VMEM limit: covers v5e's 16 MiB default and leaves headroom
# for block_b up to ~4096 f32 rows; well under v7x's 64 MiB physical VMEM.
_VMEM_LIMIT_BYTES = 32 * 1024 * 1024


def _round_up(x, m):
    return (x + m - 1) // m * m


def _critic_math(o, a, w1o, w1a, b1, w2, b2, w3, b3):
    """Shared per-tile math. o/a are cast to the weight dtype in-kernel;
    bias add / ReLU / accumulation stay in f32."""
    # Layer 1 (concat fused): h1 = relu(o @ W1_o + a @ W1_a + b1)
    h1 = (jnp.dot(o.astype(w1o.dtype), w1o, preferred_element_type=jnp.float32)
          + jnp.dot(a.astype(w1a.dtype), w1a, preferred_element_type=jnp.float32)
          + b1)
    h1 = jnp.maximum(h1, 0.0)
    # Layer 2: h2 = relu(h1 @ W2 + b2)
    h2 = jnp.dot(h1.astype(w2.dtype), w2,
                 preferred_element_type=jnp.float32) + b2
    h2 = jnp.maximum(h2, 0.0)
    # Layer 3 (out_features = 1): q = h2 @ W3 + b3   -> (tb, 1)
    q = jnp.dot(h2.astype(w3.dtype), w3,
                preferred_element_type=jnp.float32) + b3
    return q


def _critic_kernel(o_ref, a_ref, w1o_ref, w1a_ref, b1_ref, w2_ref, b2_ref,
                   w3_ref, b3_ref, q_ref):
    q_ref[...] = _critic_math(
        o_ref[...], a_ref[...], w1o_ref[...], w1a_ref[...], b1_ref[...],
        w2_ref[...], b2_ref[...], w3_ref[...], b3_ref[0],
    ).astype(q_ref.dtype)


def _stacked_critic_kernel(o_ref, a_ref, w1o_ref, w1a_ref, b1_ref, w2_ref,
                           b2_ref, w3_ref, b3_ref, q_ref):
    n = pl.program_id(0)          # agent index -> scalar bias lookup in SMEM
    q_ref[...] = _critic_math(
        o_ref[...], a_ref[...], w1o_ref[...], w1a_ref[...], b1_ref[...],
        w2_ref[...], b2_ref[...], w3_ref[...], b3_ref[n],
    ).astype(q_ref.dtype)


def prepare_critic_params(params, obs_dim, compute_dtype=jnp.float32):
    """One-time (per optimizer step) parameter prep: fused-concat split of W1,
    dtype casts and reshapes.  Keeps these XLA ops out of every forward call."""
    w1, b1, w2, b2, w3, b3 = params
    cd = jnp.dtype(compute_dtype)
    return (
        w1[:obs_dim].astype(cd),                       # W1_o  [obs_dim, H1]
        w1[obs_dim:].astype(cd),                       # W1_a  [act_dim, H1]
        jnp.asarray(b1, jnp.float32).reshape(1, -1),   # b1    [1, H1]  (f32)
        w2.astype(cd),                                 # W2    [H1, H2]
        jnp.asarray(b2, jnp.float32).reshape(1, -1),   # b2    [1, H2]  (f32)
        w3.astype(cd).reshape(-1, 1),                  # W3    [H2, 1]
        jnp.asarray(b3, jnp.float32).reshape(-1),      # b3    [1]  (SMEM)
    )


def prepare_stacked_critic_params(params_list, obs_dim,
                                  compute_dtype=jnp.float32):
    """Stack N critics' prepared params along a leading agent axis."""
    preps = [prepare_critic_params(p, obs_dim, compute_dtype)
             for p in params_list]
    stacked = [jnp.stack(arrs, axis=0) for arrs in zip(*preps)]
    stacked[-1] = stacked[-1].reshape(-1)              # b3 -> [N]
    return tuple(stacked)


def _pick_tile(B, block_b, weight_dtype):
    """Tile size: minimal sublane-rounded single tile for small batches,
    block_b (rounded to 128 for lane-dense slabs) otherwise."""
    sub = 16 if jnp.dtype(weight_dtype) == jnp.dtype(jnp.bfloat16) else 8
    if B <= block_b:
        tb = max(sub, _round_up(B, sub))
        nb = 1
        needs_pad = tb != B
    else:
        tb = _round_up(block_b, 128)
        nb = pl.cdiv(B, tb)
        needs_pad = False          # ragged boundary block handled by Pallas
    return tb, nb, needs_pad


def critic_forward(o, a, prepared, *, block_b=2048):
    """o: [B, obs_dim], a: [B, act_dim], prepared = prepare_critic_params(...)
    -> q: [B, 1] float32."""
    w1o, w1a, b1, w2, b2, w3, b3 = prepared
    B, obs_dim = o.shape
    act_dim = a.shape[1]
    hidden_1 = w1o.shape[1]
    hidden_2 = w2.shape[1]

    tb, nb, needs_pad = _pick_tile(B, block_b, w1o.dtype)
    if needs_pad:   # small-batch single-tile path only; pad cost is negligible
        o = jnp.pad(o, ((0, tb - B), (0, 0)))
        a = jnp.pad(a, ((0, tb - B), (0, 0)))
    b_out = nb * tb

    pinned = lambda i: (0, 0)      # weights/biases: same block every grid step

    q = pl.pallas_call(
        _critic_kernel,
        out_shape=jax.ShapeDtypeStruct((b_out, 1), jnp.float32),
        grid=(nb,),
        in_specs=[
            pl.BlockSpec((tb, obs_dim), lambda i: (i, 0)),
            pl.BlockSpec((tb, act_dim), lambda i: (i, 0)),
            pl.BlockSpec((obs_dim, hidden_1), pinned),
            pl.BlockSpec((act_dim, hidden_1), pinned),
            pl.BlockSpec((1, hidden_1), pinned),
            pl.BlockSpec((hidden_1, hidden_2), pinned),
            pl.BlockSpec((1, hidden_2), pinned),
            pl.BlockSpec((hidden_2, 1), pinned),
            pl.BlockSpec(memory_space=pltpu.MemorySpace.SMEM),   # b3 scalar
        ],
        out_specs=pl.BlockSpec((tb, 1), lambda i: (i, 0)),
        compiler_params=pltpu.CompilerParams(
            dimension_semantics=("parallel",),
            vmem_limit_bytes=_VMEM_LIMIT_BYTES),
    )(o, a, w1o, w1a, b1, w2, b2, w3, b3)

    return q[:B]


def critic_forward_stacked(o, a, prepared, *, block_b=2048):
    """MADDPG path: N independent critics in one pallas_call.
    o: [N, B, obs_dim], a: [N, B, act_dim],
    prepared = prepare_stacked_critic_params(...) -> q: [N, B, 1] float32."""
    w1o, w1a, b1, w2, b2, w3, b3 = prepared
    N, B, obs_dim = o.shape
    act_dim = a.shape[2]
    hidden_1 = w1o.shape[2]
    hidden_2 = w2.shape[2]

    tb, nb, needs_pad = _pick_tile(B, block_b, w1o.dtype)
    if needs_pad:
        o = jnp.pad(o, ((0, 0), (0, tb - B), (0, 0)))
        a = jnp.pad(a, ((0, 0), (0, tb - B), (0, 0)))
    b_out = nb * tb

    wmap = lambda n, i: (n, 0, 0)  # per-agent weights; resident across i sweep

    q = pl.pallas_call(
        _stacked_critic_kernel,
        out_shape=jax.ShapeDtypeStruct((N, b_out, 1), jnp.float32),
        grid=(N, nb),
        in_specs=[
            pl.BlockSpec((None, tb, obs_dim), lambda n, i: (n, i, 0)),
            pl.BlockSpec((None, tb, act_dim), lambda n, i: (n, i, 0)),
            pl.BlockSpec((None, obs_dim, hidden_1), wmap),
            pl.BlockSpec((None, act_dim, hidden_1), wmap),
            pl.BlockSpec((None, 1, hidden_1), wmap),
            pl.BlockSpec((None, hidden_1, hidden_2), wmap),
            pl.BlockSpec((None, 1, hidden_2), wmap),
            pl.BlockSpec((None, hidden_2, 1), wmap),
            pl.BlockSpec(memory_space=pltpu.MemorySpace.SMEM),   # b3 [N]
        ],
        out_specs=pl.BlockSpec((None, tb, 1), lambda n, i: (n, i, 0)),
        compiler_params=pltpu.CompilerParams(
            dimension_semantics=("parallel", "parallel"),
            vmem_limit_bytes=_VMEM_LIMIT_BYTES),
    )(o, a, w1o, w1a, b1, w2, b2, w3, b3)

    return q[:, :B, :]


def init_critic_params(key, obs_dim, act_dim, hidden_1=32, hidden_2=32):
    """Deterministic init mirroring other_net_init / final_net_init.

    Note: the reference `other_net_init` uses fan_in = weight.size(0), i.e.
    the *output* dim of the layer (as written in the original code); we
    reproduce that limit choice.  Weights are stored [in, out]."""
    obs_act_dim = obs_dim + act_dim
    k1, k2, k3, k4, k5, k6 = jax.random.split(key, 6)

    lim1 = 1.0 / hidden_1 ** 0.5
    lim2 = 1.0 / hidden_2 ** 0.5
    lim3 = 0.003  # pixel_case=False branch of final_net_init

    w1 = jax.random.uniform(k1, (obs_act_dim, hidden_1), jnp.float32, -lim1, lim1)
    b1 = jax.random.uniform(k2, (1, hidden_1), jnp.float32, -lim1, lim1)
    w2 = jax.random.uniform(k3, (hidden_1, hidden_2), jnp.float32, -lim2, lim2)
    b2 = jax.random.uniform(k4, (1, hidden_2), jnp.float32, -lim2, lim2)
    w3 = jax.random.uniform(k5, (hidden_2, 1), jnp.float32, -lim3, lim3)
    b3 = jax.random.uniform(k6, (1, 1), jnp.float32, -lim3, lim3)
    return (w1, b1, w2, b2, w3, b3)


def _critic_reference(o, a, params):
    w1, b1, w2, b2, w3, b3 = params
    oa = jnp.concatenate([o, a], axis=1)
    h = jnp.maximum(oa @ w1 + b1, 0.0)
    h = jnp.maximum(h @ w2 + b2, 0.0)
    return h @ w3 + b3


if __name__ == "__main__":
    key = jax.random.PRNGKey(0)
    k_o, k_a, k_p = jax.random.split(key, 3)

    B, obs_dim, act_dim = 2, 8, 2     # dim_info = [8, 2]
    hidden_1 = hidden_2 = 32

    o = jax.random.normal(k_o, (B, obs_dim), jnp.float32)
    a = jax.random.normal(k_a, (B, act_dim), jnp.float32)
    params = init_critic_params(k_p, obs_dim, act_dim, hidden_1, hidden_2)
    ref = _critic_reference(o, a, params)

    # f32 path (tight check against the pure-JAX reference).
    prep_f32 = prepare_critic_params(params, obs_dim, jnp.float32)
    q = jax.block_until_ready(critic_forward(o, a, prep_f32))
    assert q.shape == (B, 1)
    assert jnp.allclose(q, ref, atol=2e-5, rtol=1e-4)

    # bf16 MXU-operand path: only the (tiny) weights are pre-cast; o/a stay
    # f32 in HBM and are cast inside the kernel (no extra host-side HBM pass).
    prep_bf16 = prepare_critic_params(params, obs_dim, jnp.bfloat16)
    q_bf16 = jax.block_until_ready(critic_forward(o, a, prep_bf16))
    assert q_bf16.shape == (B, 1)
    assert jnp.allclose(q_bf16, ref, atol=5e-3, rtol=5e-2)

    # Larger batch with a small tile forces the multi-tile pipelined grid and
    # the ragged (no jnp.pad) boundary-block path.
    kb_o, kb_a = jax.random.split(jax.random.PRNGKey(1), 2)
    Bb = 600
    ob = jax.random.normal(kb_o, (Bb, obs_dim), jnp.float32)
    ab = jax.random.normal(kb_a, (Bb, act_dim), jnp.float32)
    qb = jax.block_until_ready(critic_forward(ob, ab, prep_f32, block_b=256))
    refb = _critic_reference(ob, ab, params)
    assert qb.shape == (Bb, 1)
    assert jnp.allclose(qb, refb, atol=2e-5, rtol=1e-4)

    # Stacked MADDPG critics: N agents served by one pallas_call.
    N = 3
    agent_keys = jax.random.split(jax.random.PRNGKey(2), N)
    params_n = [init_critic_params(k, obs_dim, act_dim, hidden_1, hidden_2)
                for k in agent_keys]
    prep_n = prepare_stacked_critic_params(params_n, obs_dim, jnp.float32)
    o_n = jax.random.normal(jax.random.PRNGKey(3), (N, B, obs_dim), jnp.float32)
    a_n = jax.random.normal(jax.random.PRNGKey(4), (N, B, act_dim), jnp.float32)
    q_n = jax.block_until_ready(critic_forward_stacked(o_n, a_n, prep_n))
    assert q_n.shape == (N, B, 1)
    for n in range(N):
        ref_n = _critic_reference(o_n[n], a_n[n], params_n[n])
        assert jnp.allclose(q_n[n], ref_n, atol=2e-5, rtol=1e-4)

    print("KERNEL_OK")
</pallas_src>

<mosaic_0001>
module attributes {stable_mosaic.version = 11 : i64} {
  func.func @_critic_kernel(%arg0: i32, %arg1: memref<8x8xf32, #tpu.memory_space<vmem>>, %arg2: memref<8x2xf32, #tpu.memory_space<vmem>>, %arg3: memref<8x32xf32, #tpu.memory_space<vmem>>, %arg4: memref<2x32xf32, #tpu.memory_space<vmem>>, %arg5: memref<1x32xf32, #tpu.memory_space<vmem>>, %arg6: memref<32x32xf32, #tpu.memory_space<vmem>>, %arg7: memref<1x32xf32, #tpu.memory_space<vmem>>, %arg8: memref<32x1xf32, #tpu.memory_space<vmem>>, %arg9: memref<1xf32, #tpu.memory_space<smem>>, %arg10: memref<8x1xf32, #tpu.memory_space<vmem>>) attributes {dimension_semantics = [#tpu.dimension_semantics<parallel>], iteration_bounds = array<i64: 1>, scalar_prefetch = 0 : i64, scratch_operands = 0 : i64, tpu.core_type = #tpu.core_type<tc>, window_params = [{transform_indices = @transform_0, window_bounds = array<i64: 8, 8>}, {transform_indices = @transform_1, window_bounds = array<i64: 8, 2>}, {pipeline_mode = #tpu.pipeline_mode<synchronous>, transform_indices = @transform_2, window_bounds = array<i64: 8, 32>}, {pipeline_mode = #tpu.pipeline_mode<synchronous>, transform_indices = @transform_3, window_bounds = array<i64: 2, 32>}, {pipeline_mode = #tpu.pipeline_mode<synchronous>, transform_indices = @transform_4, window_bounds = array<i64: 1, 32>}, {pipeline_mode = #tpu.pipeline_mode<synchronous>, transform_indices = @transform_5, window_bounds = array<i64: 32, 32>}, {pipeline_mode = #tpu.pipeline_mode<synchronous>, transform_indices = @transform_6, window_bounds = array<i64: 1, 32>}, {pipeline_mode = #tpu.pipeline_mode<synchronous>, transform_indices = @transform_7, window_bounds = array<i64: 32, 1>}, {transform_indices = @transform_8, window_bounds = array<i64: 1>}, {transform_indices = @transform_9, window_bounds = array<i64: 8, 1>}]} {
    %c0 = arith.constant 0 : index
    %c0_0 = arith.constant 0 : index
    %0 = vector.load %arg1[%c0, %c0_0] : memref<8x8xf32, #tpu.memory_space<vmem>>, vector<8x8xf32>
    %c0_1 = arith.constant 0 : index
    %c0_2 = arith.constant 0 : index
    %1 = vector.load %arg2[%c0_1, %c0_2] : memref<8x2xf32, #tpu.memory_space<vmem>>, vector<8x2xf32>
    %c0_3 = arith.constant 0 : index
    %c0_4 = arith.constant 0 : index
    %2 = vector.load %arg3[%c0_3, %c0_4] : memref<8x32xf32, #tpu.memory_space<vmem>>, vector<8x32xf32>
    %c0_5 = arith.constant 0 : index
    %c0_6 = arith.constant 0 : index
    %3 = vector.load %arg4[%c0_5, %c0_6] : memref<2x32xf32, #tpu.memory_space<vmem>>, vector<2x32xf32>
    %c0_7 = arith.constant 0 : index
    %c0_8 = arith.constant 0 : index
    %4 = vector.load %arg5[%c0_7, %c0_8] : memref<1x32xf32, #tpu.memory_space<vmem>>, vector<1x32xf32>
    %c0_9 = arith.constant 0 : index
    %c0_10 = arith.constant 0 : index
    %5 = vector.load %arg6[%c0_9, %c0_10] : memref<32x32xf32, #tpu.memory_space<vmem>>, vector<32x32xf32>
    %c0_11 = arith.constant 0 : index
    %c0_12 = arith.constant 0 : index
    %6 = vector.load %arg7[%c0_11, %c0_12] : memref<1x32xf32, #tpu.memory_space<vmem>>, vector<1x32xf32>
    %c0_13 = arith.constant 0 : index
    %c0_14 = arith.constant 0 : index
    %7 = vector.load %arg8[%c0_13, %c0_14] : memref<32x1xf32, #tpu.memory_space<vmem>>, vector<32x1xf32>
    %c0_15 = arith.constant 0 : index
    %8 = memref.load %arg9[%c0_15] : memref<1xf32, #tpu.memory_space<smem>>
    %cst = arith.constant dense<0.000000e+00> : vector<8x32xf32>
    %9 = tpu.matmul %0, %2, %cst {dimension_numbers = #tpu.dot_dimension_numbers<[1], [0], [0], [1], [0, 0, 1, 1], [], []>} : vector<8x8xf32>, vector<8x32xf32>, vector<8x32xf32> -> vector<8x32xf32>
    %cst_16 = arith.constant dense<0.000000e+00> : vector<8x32xf32>
    %10 = tpu.matmul %1, %3, %cst_16 {dimension_numbers = #tpu.dot_dimension_numbers<[1], [0], [0], [1], [0, 0, 1, 1], [], []>} : vector<8x2xf32>, vector<2x32xf32>, vector<8x32xf32> -> vector<8x32xf32>
    %11 = arith.addf %9, %10 : vector<8x32xf32>
    %12 = vector.broadcast %4 : vector<1x32xf32> to vector<8x32xf32>
    %13 = arith.addf %11, %12 : vector<8x32xf32>
    %cst_17 = arith.constant 0.000000e+00 : f32
    %14 = vector.broadcast %cst_17 : f32 to vector<8x32xf32>
    %15 = arith.maximumf %13, %14 : vector<8x32xf32>
    %cst_18 = arith.constant dense<0.000000e+00> : vector<8x32xf32>
    %16 = tpu.matmul %15, %5, %cst_18 {dimension_numbers = #tpu.dot_dimension_numbers<[1], [0], [0], [1], [0, 0, 1, 1], [], []>} : vector<8x32xf32>, vector<32x32xf32>, vector<8x32xf32> -> vector<8x32xf32>
    %17 = vector.broadcast %6 : vector<1x32xf32> to vector<8x32xf32>
    %18 = arith.addf %16, %17 : vector<8x32xf32>
    %cst_19 = arith.constant 0.000000e+00 : f32
    %19 = vector.broadcast %cst_19 : f32 to vector<8x32xf32>
    %20 = arith.maximumf %18, %19 : vector<8x32xf32>
    %cst_20 = arith.constant dense<0.000000e+00> : vector<8x1xf32>
    %21 = tpu.matmul %20, %7, %cst_20 {dimension_numbers = #tpu.dot_dimension_numbers<[1], [0], [0], [1], [0, 0, 1, 1], [], []>} : vector<8x32xf32>, vector<32x1xf32>, vector<8x1xf32> -> vector<8x1xf32>
    %22 = vector.broadcast %8 : f32 to vector<8x1xf32>
    %23 = arith.addf %21, %22 : vector<8x1xf32>
    %c0_21 = arith.constant 0 : index
    %c0_22 = arith.constant 0 : index
    %24 = vector.load %arg10[%c0_21, %c0_22] : memref<8x1xf32, #tpu.memory_space<vmem>>, vector<8x1xf32>
    tpu.vector_store %arg10[%c0_21, %c0_22], %23 {strides = array<i32>} : memref<8x1xf32, #tpu.memory_space<vmem>>, vector<8x1xf32>,
    return
  }
  func.func @transform_0(%arg0: i32) -> (i32, i32) {
    %c0_i32 = arith.constant 0 : i32
    %c0_i32_0 = arith.constant 0 : i32
    return %arg0, %c0_i32 : i32, i32
  }
  func.func @transform_1(%arg0: i32) -> (i32, i32) {
    %c0_i32 = arith.constant 0 : i32
    %c0_i32_0 = arith.constant 0 : i32
    return %arg0, %c0_i32 : i32, i32
  }
  func.func @transform_2(%arg0: i32) -> (i32, i32) {
    %c0_i32 = arith.constant 0 : i32
    %c0_i32_0 = arith.constant 0 : i32
    %c0_i32_1 = arith.constant 0 : i32
    return %c0_i32, %c0_i32_0 : i32, i32
  }
  func.func @transform_3(%arg0: i32) -> (i32, i32) {
    %c0_i32 = arith.constant 0 : i32
    %c0_i32_0 = arith.constant 0 : i32
    %c0_i32_1 = arith.constant 0 : i32
    return %c0_i32, %c0_i32_0 : i32, i32
  }
  func.func @transform_4(%arg0: i32) -> (i32, i32) {
    %c0_i32 = arith.constant 0 : i32
    %c0_i32_0 = arith.constant 0 : i32
    %c0_i32_1 = arith.constant 0 : i32
    return %c0_i32, %c0_i32_0 : i32, i32
  }
  func.func @transform_5(%arg0: i32) -> (i32, i32) {
    %c0_i32 = arith.constant 0 : i32
    %c0_i32_0 = arith.constant 0 : i32
    %c0_i32_1 = arith.constant 0 : i32
    return %c0_i32, %c0_i32_0 : i32, i32
  }
  func.func @transform_6(%arg0: i32) -> (i32, i32) {
    %c0_i32 = arith.constant 0 : i32
    %c0_i32_0 = arith.constant 0 : i32
    %c0_i32_1 = arith.constant 0 : i32
    return %c0_i32, %c0_i32_0 : i32, i32
  }
  func.func @transform_7(%arg0: i32) -> (i32, i32) {
    %c0_i32 = arith.constant 0 : i32
    %c0_i32_0 = arith.constant 0 : i32
    %c0_i32_1 = arith.constant 0 : i32
    return %c0_i32, %c0_i32_0 : i32, i32
  }
  func.func @transform_8(%arg0: i32) -> i32 {
    %c0_i32 = arith.constant 0 : i32
    %c0_i32_0 = arith.constant 0 : i32
    return %c0_i32 : i32
  }
  func.func @transform_9(%arg0: i32) -> (i32, i32) {
    %c0_i32 = arith.constant 0 : i32
    %c0_i32_0 = arith.constant 0 : i32
    return %arg0, %c0_i32 : i32, i32
  }
}

</mosaic_0001>

<bundles_post_ra>
// kernel: tpu_custom_call.1
= control target key start
LH: loop header
LB: loop body
LE: loop exit
PB: predicated region body
PF: predicated region fallthrough
CT: control target
= control target key end

     0   :  { %vm52_vm0 = vcmask 1041408   ;;  %v424_v0 = vmov 0.0   ;;  %vm48_vm1 = vcmask 15360   ;;  %vm126_vm2 = vcmask 64512   ;;  %s526_s3 = inlined_call_operand.vmem [shape: f32[2,32], index: 3, kind: input, shape index: {}]   ;;  %s527_s2 = inlined_call_operand.vmem [shape: f32[8,32], index: 2, kind: input, shape index: {}]   ;;  %s528_s1 = inlined_call_operand.vmem [shape: f32[8,2], index: 1, kind: input, shape index: {}]   ;;  %s529_s0 = inlined_call_operand.vmem [shape: f32[8,8], index: 0, kind: input, shape index: {}]   ;;  %s530_s5 = inlined_call_operand.vmem [shape: f32[32,32], index: 5, kind: input, shape index: {}]   ;;  %s531_s7 = inlined_call_operand.vmem [shape: f32[32,1], index: 7, kind: input, shape index: {}]   ;;  %s532_s4 = inlined_call_operand.vmem [shape: f32[1,32], index: 4, kind: input, shape index: {}]   ;;  %s533_s6 = inlined_call_operand.vmem [shape: f32[1,32], index: 6, kind: input, shape index: {}]   ;;  %s534_s8 = inlined_call_operand.<no memory space> [shape: f32[1], index: 8, kind: input, shape index: {}]   ;;  %s535_s9 = inlined_call_operand.vmem [shape: f32[8,1], index: 9, kind: output, shape index: {}]  }
   0x1   :  { %390 = vmatprep.subr.mxu0 %v424_v0  ;;  %395 = vmatprep.subr.mxu1 %v424_v0  ;;  %v36_v1 = vld [vmem:[%s526_s3] sm:$0x3]  ;;  %vm425_vm3 = vmmov 0   ;;  %v41_v5 = vld [vmem:[%s530_s5 + $0x18] sm:$0xff]  ;;  %v40_v6 = vld [vmem:[%s530_s5 + $0x10] sm:$0xff]  ;;  %vm214_vm4 = vcmask 261120   ;;  %v289_v26 = vstv %s534_s8 }
   0x2   :  { %v35_v2 = vld [vmem:[%s527_s2] sm:$0xff]  ;;  %391 = vmatpush3.msk.msra.mxu0 %vm52_vm0, %v36_v1  ;;  %392 = vmatprep.mubr.msk.f32.mxu0 %vm425_vm3, %v424_v0  ;;  %v39_v7 = vld [vmem:[%s530_s5 + $0x8] sm:$0xff]  ;;  %v46_v9 = vld [vmem:[%s531_s7 + $0x18] sm:$0xff]  ;;  %vm363_vm5 = vcmask 7168  }
   0x3   :  { %v34_v3 = vld [vmem:[%s528_s1] sm:$0xff]  ;;  %396 = vmatpush3.msra.mxu1 %v35_v2  ;;  %397 = vmatprep.mubr.msk.f32.mxu1 %vm425_vm3, %v424_v0  ;;  %v45_v18 = vld [vmem:[%s531_s7 + $0x10] sm:$0xff]  ;;  %v44_v19 = vld [vmem:[%s531_s7 + $0x8] sm:$0xff] }
   0x4   :  { %v33_v4 = vld [vmem:[%s529_s0] sm:$0xff]  ;;  %393 = vmatmul.mubr.msk.f32.vlgmr.msra.gmra.mxu0 %vm48_vm1, %v34_v3  ;;  %400 = vmatprep.subr.mxu0 %v424_v0 }
   0x5   :  { %398 = vmatmul.mubr.msk.f32.vlgmr.msra.gmra.mxu1 %vm126_vm2, %v33_v4  ;;  %408 = vmatprep.mubr.msk.f32.mxu0 %vm425_vm3, %v424_v0  ;;  %v38_v8 = vld [vmem:[%s530_s5] sm:$0xff] }
   0x6   :  { %411 = vmatprep.subr.mxu1 %v424_v0  ;;  %419 = vmatprep.mubr.msk.f32.mxu1 %vm425_vm3, %v424_v0  ;;  %v372_v11 = vld [vmem:[%s532_s4] ss:$0 sm:$0xff] }
   0x7   :  { %401 = vmatpush3.msra.mxu0 %v41_v5  ;;  %412 = vmatpush3.msra.mxu1 %v46_v9  ;;  %v43_v20 = vld [vmem:[%s531_s7] sm:$0xff] }
   0x8   :  { %402 = vmatprep.subr.mxu0 %v424_v0  ;;  %413 = vmatprep.subr.mxu1 %v424_v0  ;;  %v373_v21 = vld [vmem:[%s533_s6] ss:$0 sm:$0xff] }
   0x9   :  { %403 = vmatpush3.msra.mxu0 %v40_v6  ;;  %414 = vmatpush3.msra.mxu1 %v45_v18 }
   0xa   :  { %404 = vmatprep.subr.mxu0 %v424_v0  ;;  %415 = vmatprep.subr.mxu1 %v424_v0 }
   0xb   :  { %405 = vmatpush3.msra.mxu0 %v39_v7  ;;  %416 = vmatpush3.msra.mxu1 %v44_v19 }
   0xc   :  { %406 = vmatprep.subr.mxu0 %v424_v0  ;;  %417 = vmatprep.subr.mxu1 %v424_v0 }
   0xd   :  { %407 = vmatpush3.msra.mxu0 %v38_v8  ;;  %418 = vmatpush3.msra.mxu1 %v43_v20 }
  0xc4   :  { %v122_v10 = vpop.f32.mrf.mxu0 }
  0xc5   :  { %v196_v12 = vpop.f32.mrf.mxu1 }
  0xc6   :  { %v197_v13 = vadd.f32 %v196_v12, %v122_v10  ;;  %v394_v14 = vpop.f32.mrf.mxu0 }
  0xc7   :  { %v399_v15 = vpop.f32.mrf.mxu1 }
  0xc8   :  { %v206_v16 = vadd.f32 %v372_v11, %v197_v13 }
  0xca   :  { %v207_v17 = vmax.f32 %v206_v16, 0.0 }
  0xcc   :  { %409 = vmatmul.mubr.msk.f32.vlgmr.msra.gmra.mxu0 %vm214_vm4, %v207_v17 }
 0x18c   :  { %v284_v22 = vpop.f32.mrf.mxu0 }
 0x18d   :  { %v285_v23 = vadd.f32 %v373_v21, %v284_v22 }
 0x18e   :  { %v410_v24 = vpop.f32.mrf.mxu0 }
 0x18f   :  { %v288_v25 = vmax.f32 %v285_v23, 0.0 }
 0x191   :  { %420 = vmatmul.mubr.msk.f32.vlgmr.msra.gmra.mxu1 %vm214_vm4, %v288_v25 }
 0x251   :  { %v359_v27 = vpop.f32.mrf.mxu1 }
 0x252   :  { %v360_v28 = vadd.f32 %v359_v27, %v289_v26 }
 0x253   :  { %v421_v29 = vpop.f32.mrf.mxu1 }
 0x254   :  { %364 = vst.msk [vmem:[%s535_s9] sm:$0xff] %vm363_vm5, %v360_v28 }

</bundles_post_ra>
